<compile_context>
chip_gen: v6e
topology: v6e:2x2x1
jax: 0.10.0
libtpu: 0.0.40
codegen_flags: <defaults>
</compile_context>

<pallas_src>
import functools
import math

import jax
import jax.numpy as jnp
from jax.experimental import pallas as pl
from jax.experimental.pallas import tpu as pltpu


# Largest time tile (lanes) per grid step.  Multiple of 128.  Chosen so the
# double-buffered input + output blocks plus the per-sample im2col scratch stay far
# below the 32 MiB default scoped-VMEM limit (v7x-safe) even for modest batch sizes.
_TT_MAX = 4096


def _fe_conv_kernel(x_ref, h_ref, w_ref, a_ref, o_ref, *, K, Tt):
    """Fused Conv1d (im2col single matmul, bias folded) + PReLU for one time tile.

    x_ref: (B, Cin, Wm)       main input lanes for this tile (zero-padded input)
    h_ref: (B, Cin, 128)      halo: first lanes of the *next* tile (or zeros)
    w_ref: (Cout, K*Cin + 1)  im2col weight matrix with bias as the last column
    a_ref: (Cout, 1)          PReLU slope per output channel
    o_ref: (B, Cout, Tt)      output tile
    """
    B = x_ref.shape[0]
    Wm = x_ref.shape[2]
    need = Tt + K - 1                              # input lanes this tile consumes

    # Hoisted out of the batch loop (broadcasts are not CSE'd by JAX).
    w = w_ref[...].astype(jnp.float32)
    alpha = a_ref[...].astype(jnp.float32)
    ones_row = jnp.ones((1, Tt), jnp.float32)

    for b in range(B):                             # B is small and static
        xm = x_ref[b].astype(jnp.float32)          # (Cin, Wm)
        if Wm >= need:                             # single-tile mode: no halo needed
            win = xm
        else:                                      # tiled mode: splice next tile head
            win = jnp.concatenate([xm, h_ref[b].astype(jnp.float32)], axis=-1)
        # im2col: K lane-shifted slices stacked on sublanes, plus a ones row so the
        # bias rides along in the single MXU matmul (contraction K*Cin -> K*Cin+1).
        rows = [win[:, k:k + Tt] for k in range(K)]
        rows.append(ones_row)
        xcol = jnp.concatenate(rows, axis=0)                         # (K*Cin+1, Tt)
        acc = jnp.dot(w, xcol, preferred_element_type=jnp.float32)   # (Cout, Tt)
        acc = jnp.where(acc >= 0, acc, alpha * acc)                  # PReLU
        o_ref[b] = acc.astype(o_ref.dtype)


def front_end_conv(x, weight, bias, prelu_weight, *, out_dtype=jnp.float32):
    """FrontEndConv.forward.

    x:            (B, Cin, T)      NCT layout, as in the PyTorch module
    weight:       (Cout, Cin, K)   nn.Conv1d weight
    bias:         (Cout,)          nn.Conv1d bias
    prelu_weight: scalar / (1,) / (Cout,)   nn.PReLU weight
    returns:      (B, Cout, L)     L = T + 2*((K-1)//2) - (K-1)   (== T for odd K)
    """
    B, Cin, T = x.shape
    Cout, Cin_w, K = weight.shape
    assert Cin_w == Cin, (Cin_w, Cin)
    pad = (K - 1) // 2
    L = T + 2 * pad - (K - 1)                      # PyTorch Conv1d output length

    # --- parameters in im2col layout (tiny, built once) -------------------------
    # Column order (k*Cin + ci) matches the row order of xcol built in the kernel.
    w_mat = jnp.transpose(weight, (0, 2, 1)).reshape(Cout, K * Cin)
    w_aug = jnp.concatenate(
        [w_mat.astype(jnp.float32), bias.astype(jnp.float32).reshape(Cout, 1)],
        axis=1)                                    # (Cout, K*Cin + 1), bias folded
    a = jnp.asarray(prelu_weight, jnp.float32).reshape(-1)
    if a.shape[0] == 1:                            # nn.PReLU() default: shared slope
        a = jnp.broadcast_to(a, (Cout,))
    assert a.shape[0] == Cout, "PReLU weight must have 1 or Cout parameters"
    a_col = a.reshape(Cout, 1)

    if L <= _TT_MAX:
        # ---- single time block: output written at exactly (B, Cout, L) ---------
        Tt, NT = L, 1
        P = L + K - 1                              # == T + 2*pad, pad input ONCE
        xp = jnp.pad(x, ((0, 0), (0, 0), (pad, P - pad - T)))
        halo = jnp.zeros((B, Cin, 128), x.dtype)   # never read; keeps one kernel body
        x_spec = pl.BlockSpec((B, Cin, P), lambda j: (0, 0, 0))
        h_spec = pl.BlockSpec((B, Cin, 128), lambda j: (0, 0, 0))
        o_spec = pl.BlockSpec((B, Cout, L), lambda j: (0, 0, 0))
    else:
        # ---- long sequences: lane-dense time tiles, halo from the same padded ---
        # array via a second narrow BlockSpec on the next tile's first 128 lanes.
        Tt = _TT_MAX
        NT = pl.cdiv(L, Tt)
        P = NT * Tt + 128                          # every input block stays in-bounds
        xp = jnp.pad(x, ((0, 0), (0, 0), (pad, P - pad - T)))
        halo = xp                                  # same array, different BlockSpec
        step = Tt // 128
        x_spec = pl.BlockSpec((B, Cin, Tt), lambda j: (0, 0, j))
        h_spec = pl.BlockSpec((B, Cin, 128), lambda j: (0, 0, (j + 1) * step))
        o_spec = pl.BlockSpec((B, Cout, Tt), lambda j: (0, 0, j))

    w_spec = pl.BlockSpec((Cout, K * Cin + 1), lambda j: (0, 0))
    a_spec = pl.BlockSpec((Cout, 1), lambda j: (0, 0))

    flops = 2 * B * Cout * (K * Cin + 1) * L
    bytes_accessed = 4 * (B * Cin * T + Cout * (K * Cin + 1) + Cout + B * Cout * L)

    out = pl.pallas_call(
        functools.partial(_fe_conv_kernel, K=K, Tt=Tt),
        out_shape=jax.ShapeDtypeStruct((B, Cout, L), out_dtype),
        grid=(NT,),
        in_specs=[x_spec, h_spec, w_spec, a_spec],
        out_specs=o_spec,
        compiler_params=pltpu.CompilerParams(
            dimension_semantics=("parallel",),     # time tiles independent -> both TCs
            vmem_limit_bytes=32 * 1024 * 1024),
        cost_estimate=pl.CostEstimate(
            flops=flops, transcendentals=0, bytes_accessed=bytes_accessed),
    )(xp, halo, w_aug, a_col)
    return out


if __name__ == "__main__":
    # Small shapes consistent with FrontEndConv: in_nc=1, out_nc(c)=8, kernel w=5.
    B, in_nc, T = 2, 1, 64
    out_nc, ksize = 8, 5
    pad = (ksize - 1) // 2

    key = jax.random.PRNGKey(0)
    kx, kw, kb, kx2 = jax.random.split(key, 4)
    x = jax.random.normal(kx, (B, in_nc, T), dtype=jnp.float32)
    # kaiming_normal_(nonlinearity='leaky_relu'); bias nonzero to exercise folding.
    std = math.sqrt(2.0 / (in_nc * ksize))
    weight = std * jax.random.normal(kw, (out_nc, in_nc, ksize), dtype=jnp.float32)
    bias = 0.1 * jax.random.normal(kb, (out_nc,), dtype=jnp.float32)
    prelu_w = jnp.float32(0.25)    # nn.PReLU() default init

    def ref_fn(xi):
        r = jax.lax.conv_general_dilated(
            xi, weight, window_strides=(1,), padding=[(pad, pad)],
            dimension_numbers=("NCH", "OIH", "NCH"),
            precision=jax.lax.Precision.HIGHEST)
        r = r + bias.reshape(1, out_nc, 1)
        return jnp.where(r >= 0, r, prelu_w * r)

    # Short-sequence path (single full-L block, no crop, masked tail store only).
    out = jax.block_until_ready(front_end_conv(x, weight, bias, prelu_w))
    assert out.shape == (B, out_nc, T), out.shape
    err = float(jnp.max(jnp.abs(out - ref_fn(x))))
    assert err < 5e-2, err

    # Long-sequence path: 2 lane-dense time tiles with the halo BlockSpec.
    T2 = 2 * _TT_MAX
    x2 = jax.random.normal(kx2, (1, in_nc, T2), dtype=jnp.float32)
    out2 = jax.block_until_ready(front_end_conv(x2, weight, bias, prelu_w))
    assert out2.shape == (1, out_nc, T2), out2.shape
    err2 = float(jnp.max(jnp.abs(out2 - ref_fn(x2))))
    assert err2 < 5e-2, err2

    print("KERNEL_OK")
</pallas_src>

<mosaic_0001>
module attributes {stable_mosaic.version = 11 : i64} {
  func.func @_fe_conv_kernel(%arg0: i32, %arg1: memref<2x1x68xf32, #tpu.memory_space<vmem>>, %arg2: memref<2x1x128xf32, #tpu.memory_space<vmem>>, %arg3: memref<8x6xf32, #tpu.memory_space<vmem>>, %arg4: memref<8x1xf32, #tpu.memory_space<vmem>>, %arg5: memref<2x8x64xf32, #tpu.memory_space<vmem>>) attributes {dimension_semantics = [#tpu.dimension_semantics<parallel>], iteration_bounds = array<i64: 1>, scalar_prefetch = 0 : i64, scratch_operands = 0 : i64, tpu.core_type = #tpu.core_type<tc>, window_params = [{pipeline_mode = #tpu.pipeline_mode<synchronous>, transform_indices = @transform_0, window_bounds = array<i64: 2, 1, 68>}, {pipeline_mode = #tpu.pipeline_mode<synchronous>, transform_indices = @transform_1, window_bounds = array<i64: 2, 1, 128>}, {pipeline_mode = #tpu.pipeline_mode<synchronous>, transform_indices = @transform_2, window_bounds = array<i64: 8, 6>}, {pipeline_mode = #tpu.pipeline_mode<synchronous>, transform_indices = @transform_3, window_bounds = array<i64: 8, 1>}, {pipeline_mode = #tpu.pipeline_mode<synchronous>, transform_indices = @transform_4, window_bounds = array<i64: 2, 8, 64>}]} {
    %c0 = arith.constant 0 : index
    %c0_0 = arith.constant 0 : index
    %0 = vector.load %arg3[%c0, %c0_0] : memref<8x6xf32, #tpu.memory_space<vmem>>, vector<8x6xf32>
    %c0_1 = arith.constant 0 : index
    %c0_2 = arith.constant 0 : index
    %1 = vector.load %arg4[%c0_1, %c0_2] : memref<8x1xf32, #tpu.memory_space<vmem>>, vector<8x1xf32>
    %cst = arith.constant 1.000000e+00 : f32
    %2 = vector.broadcast %cst : f32 to vector<1x64xf32>
    %c0_3 = arith.constant 0 : index
    %c0_4 = arith.constant 0 : index
    %c0_5 = arith.constant 0 : index
    %3 = vector.load %arg1[%c0_3, %c0_4, %c0_5] : memref<2x1x68xf32, #tpu.memory_space<vmem>>, vector<1x1x68xf32>
    %4 = vector.shape_cast %3 : vector<1x1x68xf32> to vector<1x68xf32>
    %5 = vector.extract_strided_slice %4 {offsets = [0, 0], sizes = [1, 64], strides = [1, 1]} : vector<1x68xf32> to vector<1x64xf32>
    %6 = vector.extract_strided_slice %4 {offsets = [0, 1], sizes = [1, 64], strides = [1, 1]} : vector<1x68xf32> to vector<1x64xf32>
    %7 = vector.extract_strided_slice %4 {offsets = [0, 2], sizes = [1, 64], strides = [1, 1]} : vector<1x68xf32> to vector<1x64xf32>
    %8 = vector.extract_strided_slice %4 {offsets = [0, 3], sizes = [1, 64], strides = [1, 1]} : vector<1x68xf32> to vector<1x64xf32>
    %9 = vector.extract_strided_slice %4 {offsets = [0, 4], sizes = [1, 64], strides = [1, 1]} : vector<1x68xf32> to vector<1x64xf32>
    %10 = tpu.concatenate %5, %6, %7, %8, %9, %2 in 0 : vector<1x64xf32>, vector<1x64xf32>, vector<1x64xf32>, vector<1x64xf32>, vector<1x64xf32>, vector<1x64xf32> -> vector<6x64xf32>
    %cst_6 = arith.constant dense<0.000000e+00> : vector<8x64xf32>
    %11 = tpu.matmul %0, %10, %cst_6 {dimension_numbers = #tpu.dot_dimension_numbers<[1], [0], [0], [1], [0, 0, 1, 1], [], []>} : vector<8x6xf32>, vector<6x64xf32>, vector<8x64xf32> -> vector<8x64xf32>
    %cst_7 = arith.constant 0.000000e+00 : f32
    %12 = vector.broadcast %cst_7 : f32 to vector<8x64xf32>
    %13 = arith.cmpf oge, %11, %12 : vector<8x64xf32>
    %14 = vector.broadcast %1 : vector<8x1xf32> to vector<8x64xf32>
    %15 = arith.mulf %14, %11 : vector<8x64xf32>
    %16 = arith.select %13, %11, %15 : vector<8x64xi1>, vector<8x64xf32>
    %c0_8 = arith.constant 0 : index
    %c0_9 = arith.constant 0 : index
    %c0_10 = arith.constant 0 : index
    %17 = vector.load %arg5[%c0_8, %c0_9, %c0_10] : memref<2x8x64xf32, #tpu.memory_space<vmem>>, vector<1x8x64xf32>
    %18 = vector.shape_cast %17 : vector<1x8x64xf32> to vector<8x64xf32>
    %19 = vector.shape_cast %16 : vector<8x64xf32> to vector<1x8x64xf32>
    tpu.vector_store %arg5[%c0_8, %c0_9, %c0_10], %19 {strides = array<i32>} : memref<2x8x64xf32, #tpu.memory_space<vmem>>, vector<1x8x64xf32>,
    %c1 = arith.constant 1 : index
    %c0_11 = arith.constant 0 : index
    %c0_12 = arith.constant 0 : index
    %20 = vector.load %arg1[%c1, %c0_11, %c0_12] : memref<2x1x68xf32, #tpu.memory_space<vmem>>, vector<1x1x68xf32>
    %21 = vector.shape_cast %20 : vector<1x1x68xf32> to vector<1x68xf32>
    %22 = vector.extract_strided_slice %21 {offsets = [0, 0], sizes = [1, 64], strides = [1, 1]} : vector<1x68xf32> to vector<1x64xf32>
    %23 = vector.extract_strided_slice %21 {offsets = [0, 1], sizes = [1, 64], strides = [1, 1]} : vector<1x68xf32> to vector<1x64xf32>
    %24 = vector.extract_strided_slice %21 {offsets = [0, 2], sizes = [1, 64], strides = [1, 1]} : vector<1x68xf32> to vector<1x64xf32>
    %25 = vector.extract_strided_slice %21 {offsets = [0, 3], sizes = [1, 64], strides = [1, 1]} : vector<1x68xf32> to vector<1x64xf32>
    %26 = vector.extract_strided_slice %21 {offsets = [0, 4], sizes = [1, 64], strides = [1, 1]} : vector<1x68xf32> to vector<1x64xf32>
    %27 = tpu.concatenate %22, %23, %24, %25, %26, %2 in 0 : vector<1x64xf32>, vector<1x64xf32>, vector<1x64xf32>, vector<1x64xf32>, vector<1x64xf32>, vector<1x64xf32> -> vector<6x64xf32>
    %cst_13 = arith.constant dense<0.000000e+00> : vector<8x64xf32>
    %28 = tpu.matmul %0, %27, %cst_13 {dimension_numbers = #tpu.dot_dimension_numbers<[1], [0], [0], [1], [0, 0, 1, 1], [], []>} : vector<8x6xf32>, vector<6x64xf32>, vector<8x64xf32> -> vector<8x64xf32>
    %cst_14 = arith.constant 0.000000e+00 : f32
    %29 = vector.broadcast %cst_14 : f32 to vector<8x64xf32>
    %30 = arith.cmpf oge, %28, %29 : vector<8x64xf32>
    %31 = vector.broadcast %1 : vector<8x1xf32> to vector<8x64xf32>
    %32 = arith.mulf %31, %28 : vector<8x64xf32>
    %33 = arith.select %30, %28, %32 : vector<8x64xi1>, vector<8x64xf32>
    %c1_15 = arith.constant 1 : index
    %c0_16 = arith.constant 0 : index
    %c0_17 = arith.constant 0 : index
    %34 = vector.load %arg5[%c1_15, %c0_16, %c0_17] : memref<2x8x64xf32, #tpu.memory_space<vmem>>, vector<1x8x64xf32>
    %35 = vector.shape_cast %34 : vector<1x8x64xf32> to vector<8x64xf32>
    %36 = vector.shape_cast %33 : vector<8x64xf32> to vector<1x8x64xf32>
    tpu.vector_store %arg5[%c1_15, %c0_16, %c0_17], %36 {strides = array<i32>} : memref<2x8x64xf32, #tpu.memory_space<vmem>>, vector<1x8x64xf32>,
    return
  }
  func.func @transform_0(%arg0: i32) -> (i32, i32, i32) {
    %c0_i32 = arith.constant 0 : i32
    %c0_i32_0 = arith.constant 0 : i32
    %c0_i32_1 = arith.constant 0 : i32
    %c0_i32_2 = arith.constant 0 : i32
    return %c0_i32, %c0_i32_0, %c0_i32_1 : i32, i32, i32
  }
  func.func @transform_1(%arg0: i32) -> (i32, i32, i32) {
    %c0_i32 = arith.constant 0 : i32
    %c0_i32_0 = arith.constant 0 : i32
    %c0_i32_1 = arith.constant 0 : i32
    %c0_i32_2 = arith.constant 0 : i32
    return %c0_i32, %c0_i32_0, %c0_i32_1 : i32, i32, i32
  }
  func.func @transform_2(%arg0: i32) -> (i32, i32) {
    %c0_i32 = arith.constant 0 : i32
    %c0_i32_0 = arith.constant 0 : i32
    %c0_i32_1 = arith.constant 0 : i32
    return %c0_i32, %c0_i32_0 : i32, i32
  }
  func.func @transform_3(%arg0: i32) -> (i32, i32) {
    %c0_i32 = arith.constant 0 : i32
    %c0_i32_0 = arith.constant 0 : i32
    %c0_i32_1 = arith.constant 0 : i32
    return %c0_i32, %c0_i32_0 : i32, i32
  }
  func.func @transform_4(%arg0: i32) -> (i32, i32, i32) {
    %c0_i32 = arith.constant 0 : i32
    %c0_i32_0 = arith.constant 0 : i32
    %c0_i32_1 = arith.constant 0 : i32
    %c0_i32_2 = arith.constant 0 : i32
    return %c0_i32, %c0_i32_0, %c0_i32_1 : i32, i32, i32
  }
}

</mosaic_0001>

<bundles_post_ra>
// kernel: tpu_custom_call.1
= control target key start
LH: loop header
LB: loop body
LE: loop exit
PB: predicated region body
PF: predicated region fallthrough
CT: control target
= control target key end

     0   :  { %v22_v0 = vlaneseq  ;;  %s356_s0 = inlined_call_operand.vmem [shape: f32[2,1,68], index: 0, kind: input, shape index: {}]   ;;  %s357_s1 = inlined_call_operand.vmem [shape: f32[2,1,128], index: 1, kind: input, shape index: {}]   ;;  %s358_s2 = inlined_call_operand.vmem [shape: f32[8,6], index: 2, kind: input, shape index: {}]   ;;  %s359_s3 = inlined_call_operand.vmem [shape: f32[8,1], index: 3, kind: input, shape index: {}]   ;;  %s360_s4 = inlined_call_operand.hbm [shape: f32[2,8,64], index: 4, kind: output, shape index: {}]  }
   0x2   :  { %v23_v1 = vshrl.u32 %v22_v0, 7 }
   0x3   :  { %9 = vsyncpa [#allocation3], 0  ;;  %v20_v2 = vld [vmem:[%s356_s0] sm:$0x1]  ;;  %v256_v4 = vld [vmem:[%s356_s0 + $0x1] sm:$0x1] }
   0x4   :  { %v24_v3 = vsub.s32 0, %v23_v1  ;;  %s306_s1 = smov 126   ;;  %s307_s19 = smov 127   ;;  %v308_v7 = vmov 0.0   ;;  %vm309_vm0 = vmmov 0   ;;  %v310_v8 = vmov 0  }
   0x5   :  { %263 = vmatprep.subr.mxu0 %v308_v7  ;;  %268 = vmatprep.subr.mxu1 %v308_v7  ;;  %s311_s20 = smov 125   ;;  %s312_s0 = smov 124   ;;  %v19_v9 = vld [vmem:[%s359_s3] sm:$0xff]  ;;  %vm38_vm1 = vcmask 1040384   ;;  %vm40_vm2 = vcmask 1041408   ;;  %vm42_vm3 = vcmask 1042432  }
   0x6   :  { %v25_v5 = vrot.slane %v20_v2, %v24_v3  ;;  %v142_v6 = vrot.slane %v256_v4, %v24_v3  ;;  %265 = vmatprep.mubr.msk.f32.mxu0 %vm309_vm0, %v308_v7  ;;  %270 = vmatprep.mubr.msk.f32.mxu1 %vm309_vm0, %v308_v7  ;;  %vm44_vm4 = vcmask 1043456   ;;  %vm46_vm5 = vcmask 1044480   ;;  %v18_v26 = vld [vmem:[%s358_s2] sm:$0xff]  ;;  %s313_s24 = smov [#allocation2]  }
   0x7   :  { %283 = vset.pattern.permute.xlu0 %v310_v8  ;;  %vm52_vm6 = vcmask 1045504   ;;  %vm48_vm7 = vcmask 48128   ;;  %s243_s25 = sshll.u32 %s313_s24, 4  ;;  %vm134_vm8 = vcmask 523264   ;;  %s244_s25 = int_to_ptr.vmem [resolvable:$true] %s243_s25 }
   0x8   :  { %29 = vrot.lane.b32.xlu1 %v25_v5, %s306_s1  ;;  %26 = vrot.lane.b32.xlu0 %v25_v5, %s307_s19  ;;  %s284_s2 = scalar_lea.vmem %s244_s25, 256  ;;  %p289_p1 = scmp.lt.s32.totalorder %s244_s25, %s244_s25 }
   0x9   :  { %p285_p0 = scmp.ne.s32.totalorder %s244_s25, %s284_s2  ;;  %p290_p2 = scmp.lt.s32.totalorder %s284_s2, %s284_s2 }
   0xb   :  { %p291_p3 = por %p290_p2, %p289_p1 }
   0xc   :  { %146 = vrot.lane.b32.xlu1 %v142_v6, %s306_s1  ;;  %143 = vrot.lane.b32.xlu0 %v142_v6, %s307_s19 }
   0xd   :  { %p292_p4 = pnand %p291_p3, %p285_p0 }
  0x10   :  { %149 = vrot.lane.b32.xlu1 %v142_v6, %s311_s20  ;;  %32 = vrot.lane.b32.xlu0 %v25_v5, %s311_s20 }
  0x14   :  { %152 = vrot.lane.b32.xlu1 %v142_v6, %s312_s0  ;;  %35 = vrot.lane.b32.xlu0 %v25_v5, %s312_s0 }
  0x18   :  { %129 = vperm.xlu0 %283, %v19_v9  }
  0x7a   :  { %v30_v10 = vpop.permute.xlu1 %29  ;;  %v27_v11 = vpop.permute.xlu0 %26 }
  0x7b   :  { %v39_v14 = vsel %vm38_vm1, %v20_v2, %v27_v11 }
  0x7c   :  { %v41_v19 = vsel %vm40_vm2, %v39_v14, %v30_v10 }
  0x7e   :  { %v147_v12 = vpop.permute.xlu1 %146  ;;  %v144_v13 = vpop.permute.xlu0 %143 }
  0x7f   :  { %v155_v15 = vsel %vm38_vm1, %v256_v4, %v144_v13 }
  0x80   :  { %v156_v18 = vsel %vm40_vm2, %v155_v15, %v147_v12 }
  0x82   :  { %v150_v16 = vpop.permute.xlu1 %149  ;;  %v33_v17 = vpop.permute.xlu0 %32 }
  0x83   :  { %v157_v20 = vsel %vm42_vm3, %v156_v18, %v150_v16  ;;  %v43_v21 = vsel %vm42_vm3, %v41_v19, %v33_v17 }
  0x86   :  { %v153_v22 = vpop.permute.xlu1 %152  ;;  %v36_v23 = vpop.permute.xlu0 %35 }
  0x87   :  { %v158_v24 = vsel %vm44_vm4, %v157_v20, %v153_v22  ;;  %v45_v25 = vsel %vm44_vm4, %v43_v21, %v36_v23 }
  0x88   :  { %v47_v27 = vsel %vm46_vm5, %v45_v25, 1.0  ;;  %v159_v28 = vsel %vm46_vm5, %v158_v24, 1.0 }
  0x89   :  { %264 = vmatpush3.msk.msra.mxu0 %vm52_vm6, %v47_v27  ;;  %269 = vmatpush3.msk.msra.mxu1 %vm52_vm6, %v159_v28 }
  0x8a   :  { %266 = vmatmul.mubr.msk.f32.vlgmr.msra.gmra.mxu0 %vm48_vm7, %v18_v26  ;;  %271 = vmatmul.mubr.msk.f32.vlgmr.msra.gmra.mxu1 %vm48_vm7, %v18_v26 }
  0x93   :  { %v130_v29 = vpop.permute.xlu0 %129 }
 0x14a   :  { %v122_v30 = vpop.f32.mrf.mxu0  ;;  %v229_v31 = vpop.f32.mrf.mxu1 }
 0x14b   :  { %vm126_vm9 = vcmp.ge.f32.partialorder %v122_v30, 0.0  ;;  %v132_v32 = vmul.f32 %v130_v29, %v122_v30  ;;  %vm233_vm10 = vcmp.ge.f32.partialorder %v229_v31, 0.0  ;;  %v234_v33 = vmul.f32 %v229_v31, %v130_v29 }
 0x14c   :  { %v267_v34 = vpop.f32.mrf.mxu0  ;;  %v272_v35 = vpop.f32.mrf.mxu1 }
 0x14d   :  { %v133_v36 = vsel %vm126_vm9, %v122_v30, %v132_v32  ;;  %v235_v37 = vsel %vm233_vm10, %v229_v31, %v234_v33 }
 0x14e   :  { %135 = vst.msk [vmem:[#allocation2] sm:$0xff] %vm134_vm8, %v133_v36  ;;  %237 = vst.msk [vmem:[#allocation2 + $0x8] sm:$0xff] %vm134_vm8, %v235_v37 }
 0x14f   :  { %295 = shalt.err (!%p292_p4)
}
 0x150   :  { %s314_s26 = smov 128   ;;  %s315_s27 = smov 8  }
 0x151   :  { %249 = dma.vmem_to_hbm [thread:$0]  %s244_s25, 256, %s360_s4, [#allocation3], %s314_s26, %s314_s26, %s315_s27  }
 0x152   :  { %304 = dma.done.wait [#allocation3], 256  }
 0x153   :  { %305 = vsyncadd [#allocation3], 4294967040 }
 0x154   :  { %253 = vsyncpa [#allocation3], 1 }

</bundles_post_ra>
